<compile_context>
chip_gen: v6e
topology: v6e:2x2x1
jax: 0.10.0
libtpu: 0.0.40
codegen_flags: <defaults>
</compile_context>

<pallas_src>
import functools

import jax
import jax.numpy as jnp
import numpy as np
from jax.experimental import pallas as pl
from jax.experimental.pallas import tpu as pltpu


# --------------------------------------------------------------------------
# helpers
# --------------------------------------------------------------------------
def _round_up(x, m):
    return ((x + m - 1) // m) * m


def _pick_tile(h, mult, target):
    """Largest t <= target with h % t == 0 and t % mult == 0 (fallback: h)."""
    best = None
    t = mult
    while t <= min(h, target):
        if h % t == 0:
            best = t
        t += mult
    return best if best is not None else h


# --------------------------------------------------------------------------
# 1x1 conv (lateral conv) == per-pixel matmul over channels, tiled over rows.
# --------------------------------------------------------------------------
def _conv1x1_kernel(x_ref, w_ref, b_ref, o_ref):
    # x_ref: (TM, Cin), w_ref: (Cin, Cout), b_ref: (1, Cout), o_ref: (TM, Cout)
    acc = jnp.dot(x_ref[...], w_ref[...], preferred_element_type=jnp.float32)
    o_ref[...] = (acc + b_ref[...]).astype(o_ref.dtype)


def conv1x1(x_nhwc, w, b, *, tile_m=512):
    n, h, wd, cin = x_nhwc.shape
    cout = w.shape[1]
    m = n * h * wd
    x2 = x_nhwc.reshape(m, cin)
    blk_m = _round_up(m, 8) if m <= tile_m else tile_m
    m_pad = _round_up(m, blk_m)
    if m_pad != m:
        x2 = jnp.pad(x2, ((0, m_pad - m), (0, 0)))
    out = pl.pallas_call(
        _conv1x1_kernel,
        out_shape=jax.ShapeDtypeStruct((m_pad, cout), x_nhwc.dtype),
        grid=(m_pad // blk_m,),
        in_specs=[
            pl.BlockSpec((blk_m, cin), lambda i: (i, 0)),
            pl.BlockSpec((cin, cout), lambda i: (0, 0)),
            pl.BlockSpec((1, cout), lambda i: (0, 0)),
        ],
        out_specs=pl.BlockSpec((blk_m, cout), lambda i: (i, 0)),
        compiler_params=pltpu.CompilerParams(
            dimension_semantics=("parallel",)),
    )(x2, w, b.reshape(1, cout))
    return out[:m].reshape(n, h, wd, cout)


# --------------------------------------------------------------------------
# Fused top-down merge: merged = lateral + nearest_upsample(coarse).
# Rows of the coarse level are replicated inside the kernel (exact integer
# ratio fast path); columns are expanded by a static gather on the small
# coarse tensor in the wrapper.
# --------------------------------------------------------------------------
def _merge_kernel(lat_ref, up_ref, o_ref, *, fh):
    # lat_ref: (tile_h, W, C), up_ref: (tile_h // fh, W, C)
    up = up_ref[...]
    if fh > 1:
        thc, wv, cv = up.shape
        up = jnp.broadcast_to(up[:, None, :, :], (thc, fh, wv, cv))
        up = up.reshape(thc * fh, wv, cv)
    o_ref[...] = lat_ref[...] + up


def merge_topdown(lat, coarse, *, tile_h_target=16):
    n, hf, wf, c = lat.shape
    _, hc, wc, _ = coarse.shape
    # column nearest indices (torch F.interpolate 'nearest' semantics)
    col_idx = (np.arange(wf) * wc) // wf
    up = coarse[:, :, col_idx, :]                        # (n, hc, wf, c)
    if hf % hc == 0:
        fh = hf // hc                                    # in-kernel row repeat
    else:
        row_idx = (np.arange(hf) * hc) // hf             # general ratio
        up = up[:, row_idx, :, :]                        # (n, hf, wf, c)
        fh = 1
    tile_h = _pick_tile(hf, fh, max(tile_h_target, fh))
    lat3 = lat.reshape(n * hf, wf, c)
    up3 = up.reshape(n * (hf // fh), wf, c)
    nblk = (n * hf) // tile_h
    kernel = functools.partial(_merge_kernel, fh=fh)
    out = pl.pallas_call(
        kernel,
        out_shape=jax.ShapeDtypeStruct((n * hf, wf, c), lat.dtype),
        grid=(nblk,),
        in_specs=[
            pl.BlockSpec((tile_h, wf, c), lambda i: (i, 0, 0)),
            pl.BlockSpec((tile_h // fh, wf, c), lambda i: (i, 0, 0)),
        ],
        out_specs=pl.BlockSpec((tile_h, wf, c), lambda i: (i, 0, 0)),
        compiler_params=pltpu.CompilerParams(
            dimension_semantics=("parallel",)),
    )(lat3, up3)
    return out.reshape(n, hf, wf, c)


# --------------------------------------------------------------------------
# 3x3 conv, stride 1, padding 1 ("same"), tiled over (batch, row-blocks).
# The padded input stays in HBM; each grid step DMAs a (tile_h+2) row halo
# slab into VMEM scratch, then accumulates 9 shift-and-matmul taps in f32.
# --------------------------------------------------------------------------
_TAPS = tuple((dy, dx) for dy in range(3) for dx in range(3))


def _conv3x3_kernel(xp_hbm, w_ref, b_ref, o_ref, x_vmem, sem, *,
                    tile_h, width, cin, cout):
    ni = pl.program_id(0)
    hb = pl.program_id(1)
    row0 = hb * tile_h
    cp = pltpu.make_async_copy(
        xp_hbm.at[ni, pl.ds(row0, tile_h + 2), :, :], x_vmem, sem)
    cp.start()
    cp.wait()
    acc = jnp.zeros((tile_h * width, cout), jnp.float32)
    for t, (dy, dx) in enumerate(_TAPS):
        patch = x_vmem[dy:dy + tile_h, dx:dx + width, :]
        acc = acc + jnp.dot(patch.reshape(tile_h * width, cin), w_ref[t],
                            preferred_element_type=jnp.float32)
    acc = acc + b_ref[...]
    o_ref[0] = acc.reshape(tile_h, width, cout).astype(o_ref.dtype)


def conv3x3_same(x_nhwc, w33, b, *, tile_h_target=16):
    n, h, w, cin = x_nhwc.shape
    cout = w33.shape[-1]
    tile_h = _pick_tile(h, 1, tile_h_target)
    xp = jnp.pad(x_nhwc, ((0, 0), (1, 1), (1, 1), (0, 0)))   # (n, h+2, w+2, cin)
    w9 = w33.reshape(9, cin, cout)
    kernel = functools.partial(_conv3x3_kernel, tile_h=tile_h, width=w,
                               cin=cin, cout=cout)
    return pl.pallas_call(
        kernel,
        out_shape=jax.ShapeDtypeStruct((n, h, w, cout), x_nhwc.dtype),
        grid=(n, h // tile_h),
        in_specs=[
            pl.BlockSpec(memory_space=pl.ANY),                       # HBM input
            pl.BlockSpec((9, cin, cout), lambda ni, hb: (0, 0, 0)),  # resident
            pl.BlockSpec((1, cout), lambda ni, hb: (0, 0)),          # resident
        ],
        out_specs=pl.BlockSpec((1, tile_h, w, cout),
                               lambda ni, hb: (ni, hb, 0, 0)),
        scratch_shapes=[
            pltpu.VMEM((tile_h + 2, w + 2, cin), x_nhwc.dtype),
            pltpu.SemaphoreType.DMA(()),
        ],
        compiler_params=pltpu.CompilerParams(
            dimension_semantics=("parallel", "parallel"),
            vmem_limit_bytes=32 * 1024 * 1024),
    )(xp, w9, b.reshape(1, cout))


# --------------------------------------------------------------------------
# FPN forward (wrapper glue), NCHW in / NCHW out like the PyTorch module.
# --------------------------------------------------------------------------
def fpn_forward(xs_nchw, params):
    xs = [jnp.transpose(x, (0, 2, 3, 1)) for x in xs_nchw]          # -> NHWC
    laterals = [conv1x1(x, params["lat_w"][i], params["lat_b"][i])
                for i, x in enumerate(xs)]
    num = len(laterals)
    merged = list(laterals)
    for i in range(num - 1, 0, -1):
        merged[i - 1] = merge_topdown(laterals[i - 1], merged[i])
    outs = [conv3x3_same(merged[i], params["fpn_w"][i], params["fpn_b"][i])
            for i in range(num)]
    return [jnp.transpose(o, (0, 3, 1, 2)) for o in outs]           # -> NCHW


# --------------------------------------------------------------------------
# Pure-JAX reference (lax.conv) for numerical verification.
# --------------------------------------------------------------------------
def fpn_reference(xs_nchw, params):
    laterals = []
    for i, x in enumerate(xs_nchw):
        k = jnp.transpose(params["lat_w"][i], (1, 0))[:, :, None, None]  # OIHW
        y = jax.lax.conv_general_dilated(
            x, k, (1, 1), "VALID",
            dimension_numbers=("NCHW", "OIHW", "NCHW"))
        laterals.append(y + params["lat_b"][i][None, :, None, None])
    for i in range(len(laterals) - 1, 0, -1):
        h, w = laterals[i - 1].shape[2:]
        src = laterals[i]
        rows = (jnp.arange(h) * src.shape[2]) // h
        cols = (jnp.arange(w) * src.shape[3]) // w
        laterals[i - 1] = laterals[i - 1] + src[:, :, rows][:, :, :, cols]
    outs = []
    for i, lat in enumerate(laterals):
        k = jnp.transpose(params["fpn_w"][i], (3, 2, 0, 1))               # OIHW
        y = jax.lax.conv_general_dilated(
            lat, k, (1, 1), ((1, 1), (1, 1)),
            dimension_numbers=("NCHW", "OIHW", "NCHW"))
        outs.append(y + params["fpn_b"][i][None, :, None, None])
    return outs


def init_params(key, in_channels, out_channels):
    params = {"lat_w": [], "lat_b": [], "fpn_w": [], "fpn_b": []}
    for cin in in_channels:
        key, k1, k2, k3, k4 = jax.random.split(key, 5)
        params["lat_w"].append(
            jax.random.normal(k1, (cin, out_channels), jnp.float32)
            / np.sqrt(cin))
        params["lat_b"].append(
            0.01 * jax.random.normal(k2, (out_channels,), jnp.float32))
        params["fpn_w"].append(
            jax.random.normal(k3, (3, 3, out_channels, out_channels),
                              jnp.float32) / np.sqrt(9 * out_channels))
        params["fpn_b"].append(
            0.01 * jax.random.normal(k4, (out_channels,), jnp.float32))
    return params


if __name__ == "__main__":
    def run_case(in_channels, out_channels, spatial, batch, key):
        params = init_params(key, in_channels, out_channels)
        xs = []
        for cin, s in zip(in_channels, spatial):
            key, sub = jax.random.split(key)
            xs.append(jax.random.normal(sub, (batch, cin, s, s), jnp.float32))
        outs = fpn_forward(xs, params)
        outs = [jax.block_until_ready(o) for o in outs]
        refs = fpn_reference(xs, params)
        for o, r in zip(outs, refs):
            assert o.shape == r.shape, (o.shape, r.shape)
            np.testing.assert_allclose(np.asarray(o), np.asarray(r),
                                       rtol=1e-2, atol=1e-2)

    key = jax.random.PRNGKey(0)
    k1, k2 = jax.random.split(key)
    # standard 2x pyramid (exercises the fused in-kernel row-upsample path)
    run_case([4, 8, 16], 8, [16, 8, 4], 2, k1)
    # non-integer spatial ratio (exercises the general nearest path)
    run_case([4, 8], 8, [12, 5], 2, k2)

    print("KERNEL_OK")
</pallas_src>

<mosaic_0001>
module attributes {stable_mosaic.version = 11 : i64} {
  func.func @_conv1x1_kernel(%arg0: i32, %arg1: memref<512x4xf32, #tpu.memory_space<vmem>>, %arg2: memref<4x8xf32, #tpu.memory_space<vmem>>, %arg3: memref<1x8xf32, #tpu.memory_space<vmem>>, %arg4: memref<512x8xf32, #tpu.memory_space<vmem>>) attributes {dimension_semantics = [#tpu.dimension_semantics<parallel>], iteration_bounds = array<i64: 1>, scalar_prefetch = 0 : i64, scratch_operands = 0 : i64, tpu.core_type = #tpu.core_type<tc>, window_params = [{transform_indices = @transform_0, window_bounds = array<i64: 512, 4>}, {pipeline_mode = #tpu.pipeline_mode<synchronous>, transform_indices = @transform_1, window_bounds = array<i64: 4, 8>}, {pipeline_mode = #tpu.pipeline_mode<synchronous>, transform_indices = @transform_2, window_bounds = array<i64: 1, 8>}, {transform_indices = @transform_3, window_bounds = array<i64: 512, 8>}]} {
    %c0 = arith.constant 0 : index
    %c0_0 = arith.constant 0 : index
    %0 = vector.load %arg1[%c0, %c0_0] : memref<512x4xf32, #tpu.memory_space<vmem>>, vector<512x4xf32>
    %c0_1 = arith.constant 0 : index
    %c0_2 = arith.constant 0 : index
    %1 = vector.load %arg2[%c0_1, %c0_2] : memref<4x8xf32, #tpu.memory_space<vmem>>, vector<4x8xf32>
    %cst = arith.constant dense<0.000000e+00> : vector<512x8xf32>
    %2 = tpu.matmul %0, %1, %cst {dimension_numbers = #tpu.dot_dimension_numbers<[1], [0], [0], [1], [0, 0, 1, 1], [], []>} : vector<512x4xf32>, vector<4x8xf32>, vector<512x8xf32> -> vector<512x8xf32>
    %c0_3 = arith.constant 0 : index
    %c0_4 = arith.constant 0 : index
    %3 = vector.load %arg3[%c0_3, %c0_4] : memref<1x8xf32, #tpu.memory_space<vmem>>, vector<1x8xf32>
    %4 = vector.broadcast %3 : vector<1x8xf32> to vector<512x8xf32>
    %5 = arith.addf %2, %4 : vector<512x8xf32>
    %c0_5 = arith.constant 0 : index
    %c0_6 = arith.constant 0 : index
    %6 = vector.load %arg4[%c0_5, %c0_6] : memref<512x8xf32, #tpu.memory_space<vmem>>, vector<512x8xf32>
    tpu.vector_store %arg4[%c0_5, %c0_6], %5 {strides = array<i32>} : memref<512x8xf32, #tpu.memory_space<vmem>>, vector<512x8xf32>,
    return
  }
  func.func @transform_0(%arg0: i32) -> (i32, i32) {
    %c0_i32 = arith.constant 0 : i32
    %c0_i32_0 = arith.constant 0 : i32
    return %arg0, %c0_i32 : i32, i32
  }
  func.func @transform_1(%arg0: i32) -> (i32, i32) {
    %c0_i32 = arith.constant 0 : i32
    %c0_i32_0 = arith.constant 0 : i32
    %c0_i32_1 = arith.constant 0 : i32
    return %c0_i32, %c0_i32_0 : i32, i32
  }
  func.func @transform_2(%arg0: i32) -> (i32, i32) {
    %c0_i32 = arith.constant 0 : i32
    %c0_i32_0 = arith.constant 0 : i32
    %c0_i32_1 = arith.constant 0 : i32
    return %c0_i32, %c0_i32_0 : i32, i32
  }
  func.func @transform_3(%arg0: i32) -> (i32, i32) {
    %c0_i32 = arith.constant 0 : i32
    %c0_i32_0 = arith.constant 0 : i32
    return %arg0, %c0_i32 : i32, i32
  }
}

</mosaic_0001>

<bundles_post_ra>
// kernel: tpu_custom_call.1
= control target key start
LH: loop header
LB: loop body
LE: loop exit
PB: predicated region body
PF: predicated region fallthrough
CT: control target
= control target key end

     0   :  { %vm279_vm0 = vcmask 1043456   ;;  %vm86_vm1 = vcmask 31744   ;;  %vm668_vm2 = vcmask 64512   ;;  %s1572_s1 = inlined_call_operand.vmem [shape: f32[4,8], index: 1, kind: input, shape index: {}]   ;;  %s1573_s0 = inlined_call_operand.vmem [shape: f32[512,4], index: 0, kind: input, shape index: {}]   ;;  %s1574_s2 = inlined_call_operand.vmem [shape: f32[1,8], index: 2, kind: input, shape index: {}]   ;;  %s1575_s3 = inlined_call_operand.vmem [shape: f32[512,8], index: 3, kind: output, shape index: {}]  }
   0x1   :  { %v78_v0 = vld [vmem:[%s1572_s1] sm:$0xf]  ;;  %v15_v3 = vld [vmem:[%s1573_s0 + $0x8] sm:$0xff]  ;;  %v16_v5 = vld [vmem:[%s1573_s0 + $0x10] sm:$0xff] }
   0x2   :  { %v14_v1 = vld [vmem:[%s1573_s0] sm:$0xff]  ;;  %868 = vmatprep.subr.msk.mxu0 %vm279_vm0, %v78_v0  ;;  %966 = vmatprep.subr.msk.mxu1 %vm279_vm0, %v78_v0  ;;  %v47_v4 = vld [vmem:[%s1573_s0 + $0x108] sm:$0xff]  ;;  %v48_v6 = vld [vmem:[%s1573_s0 + $0x110] sm:$0xff] }
   0x3   :  { %v46_v2 = vld [vmem:[%s1573_s0 + $0x100] sm:$0xff]  ;;  %869 = vmatpush3.msk.msra.mxu0 %vm279_vm0, %v78_v0  ;;  %967 = vmatpush3.msk.msra.mxu1 %vm279_vm0, %v78_v0  ;;  %v17_v7 = vld [vmem:[%s1573_s0 + $0x18] sm:$0xff]  ;;  %v19_v11 = vld [vmem:[%s1573_s0 + $0x28] sm:$0xff] }
   0x4   :  { %870 = vmatprep.mubr.msk.f32.mxu0 %vm86_vm1, %v14_v1  ;;  %918 = vmatprep.mubr.msk.f32.mxu1 %vm86_vm1, %v46_v2  ;;  %v49_v8 = vld [vmem:[%s1573_s0 + $0x118] sm:$0xff]  ;;  %v18_v9 = vld [vmem:[%s1573_s0 + $0x20] sm:$0xff]  ;;  %v51_v12 = vld [vmem:[%s1573_s0 + $0x128] sm:$0xff] }
   0x5   :  { %871 = vmatmul.mubr.msk.f32.vlgmr.msra.gmra.mxu0 %vm86_vm1, %v15_v3  ;;  %919 = vmatmul.mubr.msk.f32.vlgmr.msra.gmra.mxu1 %vm86_vm1, %v47_v4  ;;  %v50_v10 = vld [vmem:[%s1573_s0 + $0x120] sm:$0xff]  ;;  %v20_v13 = vld [vmem:[%s1573_s0 + $0x30] sm:$0xff]  ;;  %v21_v15 = vld [vmem:[%s1573_s0 + $0x38] sm:$0xff] }
   0x6   :  { %873 = vmatprep.mubr.msk.f32.mxu0 %vm86_vm1, %v16_v5  ;;  %921 = vmatprep.mubr.msk.f32.mxu1 %vm86_vm1, %v48_v6  ;;  %v52_v14 = vld [vmem:[%s1573_s0 + $0x130] sm:$0xff]  ;;  %v53_v16 = vld [vmem:[%s1573_s0 + $0x138] sm:$0xff]  ;;  %v22_v17 = vld [vmem:[%s1573_s0 + $0x40] sm:$0xff] }
   0x7   :  { %v54_v18 = vld [vmem:[%s1573_s0 + $0x140] sm:$0xff]  ;;  %v23_v19 = vld [vmem:[%s1573_s0 + $0x48] sm:$0xff]  ;;  %v24_v21 = vld [vmem:[%s1573_s0 + $0x50] sm:$0xff] }
   0x8   :  { %v55_v20 = vld [vmem:[%s1573_s0 + $0x148] sm:$0xff]  ;;  %v56_v22 = vld [vmem:[%s1573_s0 + $0x150] sm:$0xff]  ;;  %v25_v23 = vld [vmem:[%s1573_s0 + $0x58] sm:$0xff] }
   0x9   :  { %874 = vmatmul.mubr.msk.f32.gmra.mxu0 %vm86_vm1, %v17_v7  ;;  %922 = vmatmul.mubr.msk.f32.gmra.mxu1 %vm86_vm1, %v49_v8  ;;  %v57_v24 = vld [vmem:[%s1573_s0 + $0x158] sm:$0xff]  ;;  %v26_v25 = vld [vmem:[%s1573_s0 + $0x60] sm:$0xff]  ;;  %v27_v27 = vld [vmem:[%s1573_s0 + $0x68] sm:$0xff] }
   0xa   :  { %876 = vmatprep.mubr.msk.f32.mxu0 %vm86_vm1, %v18_v9  ;;  %924 = vmatprep.mubr.msk.f32.mxu1 %vm86_vm1, %v50_v10  ;;  %v58_v26 = vld [vmem:[%s1573_s0 + $0x160] sm:$0xff]  ;;  %v59_v28 = vld [vmem:[%s1573_s0 + $0x168] sm:$0xff]  ;;  %v28_v29 = vld [vmem:[%s1573_s0 + $0x70] sm:$0xff] }
   0xb   :  { %v60_v30 = vld [vmem:[%s1573_s0 + $0x170] sm:$0xff]  ;;  %v29_v31 = vld [vmem:[%s1573_s0 + $0x78] sm:$0xff]  ;;  %v30_v33 = vld [vmem:[%s1573_s0 + $0x80] sm:$0xff] }
   0xc   :  { %v61_v32 = vld [vmem:[%s1573_s0 + $0x178] sm:$0xff]  ;;  %v62_v34 = vld [vmem:[%s1573_s0 + $0x180] sm:$0xff]  ;;  %v31_v35 = vld [vmem:[%s1573_s0 + $0x88] sm:$0xff] }
   0xd   :  { %877 = vmatmul.mubr.msk.f32.gmra.mxu0 %vm86_vm1, %v19_v11  ;;  %925 = vmatmul.mubr.msk.f32.gmra.mxu1 %vm86_vm1, %v51_v12  ;;  %v63_v36 = vld [vmem:[%s1573_s0 + $0x188] sm:$0xff]  ;;  %v32_v37 = vld [vmem:[%s1573_s0 + $0x90] sm:$0xff]  ;;  %v33_v39 = vld [vmem:[%s1573_s0 + $0x98] sm:$0xff] }
   0xe   :  { %879 = vmatprep.mubr.msk.f32.mxu0 %vm86_vm1, %v20_v13  ;;  %927 = vmatprep.mubr.msk.f32.mxu1 %vm86_vm1, %v52_v14  ;;  %v64_v38 = vld [vmem:[%s1573_s0 + $0x190] sm:$0xff]  ;;  %v65_v40 = vld [vmem:[%s1573_s0 + $0x198] sm:$0xff]  ;;  %v34_v41 = vld [vmem:[%s1573_s0 + $0xa0] sm:$0xff] }
   0xf   :  { %v66_v42 = vld [vmem:[%s1573_s0 + $0x1a0] sm:$0xff]  ;;  %v35_v43 = vld [vmem:[%s1573_s0 + $0xa8] sm:$0xff]  ;;  %v36_v45 = vld [vmem:[%s1573_s0 + $0xb0] sm:$0xff] }
  0x10   :  { %v67_v44 = vld [vmem:[%s1573_s0 + $0x1a8] sm:$0xff]  ;;  %v68_v46 = vld [vmem:[%s1573_s0 + $0x1b0] sm:$0xff]  ;;  %v37_v47 = vld [vmem:[%s1573_s0 + $0xb8] sm:$0xff] }
  0x11   :  { %880 = vmatmul.mubr.msk.f32.gmra.mxu0 %vm86_vm1, %v21_v15  ;;  %928 = vmatmul.mubr.msk.f32.gmra.mxu1 %vm86_vm1, %v53_v16  ;;  %v69_v48 = vld [vmem:[%s1573_s0 + $0x1b8] sm:$0xff]  ;;  %v38_v49 = vld [vmem:[%s1573_s0 + $0xc0] sm:$0xff]  ;;  %v39_v51 = vld [vmem:[%s1573_s0 + $0xc8] sm:$0xff] }
  0x12   :  { %882 = vmatprep.mubr.msk.f32.mxu0 %vm86_vm1, %v22_v17  ;;  %930 = vmatprep.mubr.msk.f32.mxu1 %vm86_vm1, %v54_v18  ;;  %v70_v50 = vld [vmem:[%s1573_s0 + $0x1c0] sm:$0xff]  ;;  %v71_v52 = vld [vmem:[%s1573_s0 + $0x1c8] sm:$0xff]  ;;  %v40_v53 = vld [vmem:[%s1573_s0 + $0xd0] sm:$0xff] }
  0x13   :  { %v72_v54 = vld [vmem:[%s1573_s0 + $0x1d0] sm:$0xff]  ;;  %v41_v55 = vld [vmem:[%s1573_s0 + $0xd8] sm:$0xff]  ;;  %v42_v57 = vld [vmem:[%s1573_s0 + $0xe0] sm:$0xff] }
  0x14   :  { %v73_v56 = vld [vmem:[%s1573_s0 + $0x1d8] sm:$0xff]  ;;  %v74_v58 = vld [vmem:[%s1573_s0 + $0x1e0] sm:$0xff]  ;;  %v43_v59 = vld [vmem:[%s1573_s0 + $0xe8] sm:$0xff] }
  0x15   :  { %883 = vmatmul.mubr.msk.f32.gmra.mxu0 %vm86_vm1, %v23_v19  ;;  %931 = vmatmul.mubr.msk.f32.gmra.mxu1 %vm86_vm1, %v55_v20  ;;  %v75_v60 = vld [vmem:[%s1573_s0 + $0x1e8] sm:$0xff]  ;;  %v44_v61 = vld [vmem:[%s1573_s0 + $0xf0] sm:$0xff]  ;;  %v45_v63 = vld [vmem:[%s1573_s0 + $0xf8] sm:$0xff] }
  0x16   :  { %885 = vmatprep.mubr.msk.f32.mxu0 %vm86_vm1, %v24_v21  ;;  %933 = vmatprep.mubr.msk.f32.mxu1 %vm86_vm1, %v56_v22  ;;  %v76_v62 = vld [vmem:[%s1573_s0 + $0x1f0] sm:$0xff]  ;;  %v77_v0 = vld [vmem:[%s1573_s0 + $0x1f8] sm:$0xff]  ;;  %v1250_v1 = vld [vmem:[%s1574_s2] ss:$0 sm:$0xff] }
  0x19   :  { %886 = vmatmul.mubr.msk.f32.gmra.mxu0 %vm86_vm1, %v25_v23  ;;  %934 = vmatmul.mubr.msk.f32.gmra.mxu1 %vm86_vm1, %v57_v24 }
  0x1a   :  { %888 = vmatprep.mubr.msk.f32.mxu0 %vm86_vm1, %v26_v25  ;;  %936 = vmatprep.mubr.msk.f32.mxu1 %vm86_vm1, %v58_v26 }
  0x1d   :  { %889 = vmatmul.mubr.msk.f32.gmra.mxu0 %vm86_vm1, %v27_v27  ;;  %937 = vmatmul.mubr.msk.f32.gmra.mxu1 %vm86_vm1, %v59_v28 }
  0x1e   :  { %891 = vmatprep.mubr.msk.f32.mxu0 %vm86_vm1, %v28_v29  ;;  %939 = vmatprep.mubr.msk.f32.mxu1 %vm86_vm1, %v60_v30 }
  0x21   :  { %892 = vmatmul.mubr.msk.f32.gmra.mxu0 %vm86_vm1, %v29_v31  ;;  %940 = vmatmul.mubr.msk.f32.gmra.mxu1 %vm86_vm1, %v61_v32 }
  0x22   :  { %894 = vmatprep.mubr.msk.f32.mxu0 %vm86_vm1, %v30_v33  ;;  %942 = vmatprep.mubr.msk.f32.mxu1 %vm86_vm1, %v62_v34 }
  0x25   :  { %895 = vmatmul.mubr.msk.f32.gmra.mxu0 %vm86_vm1, %v31_v35  ;;  %943 = vmatmul.mubr.msk.f32.gmra.mxu1 %vm86_vm1, %v63_v36 }
  0x26   :  { %897 = vmatprep.mubr.msk.f32.mxu0 %vm86_vm1, %v32_v37  ;;  %945 = vmatprep.mubr.msk.f32.mxu1 %vm86_vm1, %v64_v38 }
  0x29   :  { %898 = vmatmul.mubr.msk.f32.gmra.mxu0 %vm86_vm1, %v33_v39  ;;  %946 = vmatmul.mubr.msk.f32.gmra.mxu1 %vm86_vm1, %v65_v40 }
  0x2a   :  { %900 = vmatprep.mubr.msk.f32.mxu0 %vm86_vm1, %v34_v41  ;;  %948 = vmatprep.mubr.msk.f32.mxu1 %vm86_vm1, %v66_v42 }
  0x2d   :  { %901 = vmatmul.mubr.msk.f32.gmra.mxu0 %vm86_vm1, %v35_v43  ;;  %949 = vmatmul.mubr.msk.f32.gmra.mxu1 %vm86_vm1, %v67_v44 }
  0x2e   :  { %903 = vmatprep.mubr.msk.f32.mxu0 %vm86_vm1, %v36_v45  ;;  %951 = vmatprep.mubr.msk.f32.mxu1 %vm86_vm1, %v68_v46 }
  0x31   :  { %904 = vmatmul.mubr.msk.f32.gmra.mxu0 %vm86_vm1, %v37_v47  ;;  %952 = vmatmul.mubr.msk.f32.gmra.mxu1 %vm86_vm1, %v69_v48 }
  0x32   :  { %906 = vmatprep.mubr.msk.f32.mxu0 %vm86_vm1, %v38_v49  ;;  %954 = vmatprep.mubr.msk.f32.mxu1 %vm86_vm1, %v70_v50 }
  0x35   :  { %907 = vmatmul.mubr.msk.f32.gmra.mxu0 %vm86_vm1, %v39_v51  ;;  %955 = vmatmul.mubr.msk.f32.gmra.mxu1 %vm86_vm1, %v71_v52 }
  0x36   :  { %909 = vmatprep.mubr.msk.f32.mxu0 %vm86_vm1, %v40_v53  ;;  %957 = vmatprep.mubr.msk.f32.mxu1 %vm86_vm1, %v72_v54 }
  0x39   :  { %910 = vmatmul.mubr.msk.f32.gmra.mxu0 %vm86_vm1, %v41_v55  ;;  %958 = vmatmul.mubr.msk.f32.gmra.mxu1 %vm86_vm1, %v73_v56 }
  0x3a   :  { %912 = vmatprep.mubr.msk.f32.mxu0 %vm86_vm1, %v42_v57  ;;  %960 = vmatprep.mubr.msk.f32.mxu1 %vm86_vm1, %v74_v58 }
  0x3d   :  { %913 = vmatmul.mubr.msk.f32.gmra.mxu0 %vm86_vm1, %v43_v59  ;;  %961 = vmatmul.mubr.msk.f32.gmra.mxu1 %vm86_vm1, %v75_v60 }
  0x3e   :  { %915 = vmatprep.mubr.msk.f32.mxu0 %vm86_vm1, %v44_v61  ;;  %963 = vmatprep.mubr.msk.f32.mxu1 %vm86_vm1, %v76_v62 }
  0x41   :  { %916 = vmatmul.mubr.msk.f32.gmra.mxu0 %vm86_vm1, %v45_v63  ;;  %964 = vmatmul.mubr.msk.f32.gmra.mxu1 %vm86_vm1, %v77_v0 }
  0xc5   :  { %v872_v2 = vpop.f32.mrf.mxu0  ;;  %v920_v3 = vpop.f32.mrf.mxu1 }
  0xc6   :  { %v355_v4 = vadd.f32 %v872_v2, %v1250_v1  ;;  %v515_v5 = vadd.f32 %v920_v3, %v1250_v1 }
  0xc7   :  { %v349_v6 = vpop.f32.mrf.mxu0  ;;  %v509_v7 = vpop.f32.mrf.mxu1 }
  0xc8   :  { %670 = vst.msk [vmem:[%s1575_s3 + $0x8] sm:$0xff] %vm668_vm2, %v355_v4  ;;  %702 = vst.msk [vmem:[%s1575_s3 + $0x108] sm:$0xff] %vm668_vm2, %v515_v5  ;;  %v350_v8 = vadd.f32 %v1250_v1, %v349_v6  ;;  %v510_v9 = vadd.f32 %v1250_v1, %v509_v7 }
  0xc9   :  { %v875_v10 = vpop.f32.mrf.mxu0  ;;  %v923_v11 = vpop.f32.mrf.mxu1 }
  0xca   :  { %669 = vst.msk [vmem:[%s1575_s3] sm:$0xff] %vm668_vm2, %v350_v8  ;;  %701 = vst.msk [vmem:[%s1575_s3 + $0x100] sm:$0xff] %vm668_vm2, %v510_v9  ;;  %v365_v12 = vadd.f32 %v875_v10, %v1250_v1  ;;  %v525_v13 = vadd.f32 %v923_v11, %v1250_v1 }
  0xcb   :  { %v359_v14 = vpop.f32.mrf.mxu0  ;;  %v519_v15 = vpop.f32.mrf.mxu1 }
  0xcc   :  { %672 = vst.msk [vmem:[%s1575_s3 + $0x18] sm:$0xff] %vm668_vm2, %v365_v12  ;;  %704 = vst.msk [vmem:[%s1575_s3 + $0x118] sm:$0xff] %vm668_vm2, %v525_v13  ;;  %v360_v16 = vadd.f32 %v1250_v1, %v359_v14  ;;  %v520_v17 = vadd.f32 %v1250_v1, %v519_v15 }
  0xcd   :  { %v878_v18 = vpop.f32.mrf.mxu0  ;;  %v926_v19 = vpop.f32.mrf.mxu1 }
  0xce   :  { %671 = vst.msk [vmem:[%s1575_s3 + $0x10] sm:$0xff] %vm668_vm2, %v360_v16  ;;  %703 = vst.msk [vmem:[%s1575_s3 + $0x110] sm:$0xff] %vm668_vm2, %v520_v17  ;;  %v375_v20 = vadd.f32 %v878_v18, %v1250_v1  ;;  %v535_v21 = vadd.f32 %v926_v19, %v1250_v1 }
  0xcf   :  { %v369_v22 = vpop.f32.mrf.mxu0  ;;  %v529_v23 = vpop.f32.mrf.mxu1 }
  0xd0   :  { %674 = vst.msk [vmem:[%s1575_s3 + $0x28] sm:$0xff] %vm668_vm2, %v375_v20  ;;  %706 = vst.msk [vmem:[%s1575_s3 + $0x128] sm:$0xff] %vm668_vm2, %v535_v21  ;;  %v370_v24 = vadd.f32 %v1250_v1, %v369_v22  ;;  %v530_v25 = vadd.f32 %v1250_v1, %v529_v23 }
  0xd1   :  { %v881_v26 = vpop.f32.mrf.mxu0  ;;  %v929_v27 = vpop.f32.mrf.mxu1 }
  0xd2   :  { %673 = vst.msk [vmem:[%s1575_s3 + $0x20] sm:$0xff] %vm668_vm2, %v370_v24  ;;  %705 = vst.msk [vmem:[%s1575_s3 + $0x120] sm:$0xff] %vm668_vm2, %v530_v25  ;;  %v385_v28 = vadd.f32 %v881_v26, %v1250_v1  ;;  %v545_v29 = vadd.f32 %v929_v27, %v1250_v1 }
  0xd3   :  { %v379_v30 = vpop.f32.mrf.mxu0  ;;  %v539_v31 = vpop.f32.mrf.mxu1 }
  0xd4   :  { %676 = vst.msk [vmem:[%s1575_s3 + $0x38] sm:$0xff] %vm668_vm2, %v385_v28  ;;  %708 = vst.msk [vmem:[%s1575_s3 + $0x138] sm:$0xff] %vm668_vm2, %v545_v29  ;;  %v380_v32 = vadd.f32 %v1250_v1, %v379_v30  ;;  %v540_v33 = vadd.f32 %v1250_v1, %v539_v31 }
  0xd5   :  { %v884_v34 = vpop.f32.mrf.mxu0  ;;  %v932_v35 = vpop.f32.mrf.mxu1 }
  0xd6   :  { %675 = vst.msk [vmem:[%s1575_s3 + $0x30] sm:$0xff] %vm668_vm2, %v380_v32  ;;  %707 = vst.msk [vmem:[%s1575_s3 + $0x130] sm:$0xff] %vm668_vm2, %v540_v33  ;;  %v395_v36 = vadd.f32 %v884_v34, %v1250_v1  ;;  %v555_v37 = vadd.f32 %v932_v35, %v1250_v1 }
  0xd7   :  { %v389_v38 = vpop.f32.mrf.mxu0  ;;  %v549_v39 = vpop.f32.mrf.mxu1 }
  0xd8   :  { %678 = vst.msk [vmem:[%s1575_s3 + $0x48] sm:$0xff] %vm668_vm2, %v395_v36  ;;  %710 = vst.msk [vmem:[%s1575_s3 + $0x148] sm:$0xff] %vm668_vm2, %v555_v37  ;;  %v390_v40 = vadd.f32 %v1250_v1, %v389_v38  ;;  %v550_v41 = vadd.f32 %v1250_v1, %v549_v39 }
  0xd9   :  { %v887_v42 = vpop.f32.mrf.mxu0  ;;  %v935_v43 = vpop.f32.mrf.mxu1 }
  0xda   :  { %677 = vst.msk [vmem:[%s1575_s3 + $0x40] sm:$0xff] %vm668_vm2, %v390_v40  ;;  %709 = vst.msk [vmem:[%s1575_s3 + $0x140] sm:$0xff] %vm668_vm2, %v550_v41  ;;  %v405_v44 = vadd.f32 %v887_v42, %v1250_v1  ;;  %v565_v45 = vadd.f32 %v935_v43, %v1250_v1 }
  0xdb   :  { %v399_v46 = vpop.f32.mrf.mxu0  ;;  %v559_v47 = vpop.f32.mrf.mxu1 }
  0xdc   :  { %680 = vst.msk [vmem:[%s1575_s3 + $0x58] sm:$0xff] %vm668_vm2, %v405_v44  ;;  %712 = vst.msk [vmem:[%s1575_s3 + $0x158] sm:$0xff] %vm668_vm2, %v565_v45  ;;  %v400_v48 = vadd.f32 %v1250_v1, %v399_v46  ;;  %v560_v49 = vadd.f32 %v1250_v1, %v559_v47 }
  0xdd   :  { %v890_v50 = vpop.f32.mrf.mxu0  ;;  %v938_v51 = vpop.f32.mrf.mxu1 }
  0xde   :  { %679 = vst.msk [vmem:[%s1575_s3 + $0x50] sm:$0xff] %vm668_vm2, %v400_v48  ;;  %711 = vst.msk [vmem:[%s1575_s3 + $0x150] sm:$0xff] %vm668_vm2, %v560_v49  ;;  %v415_v52 = vadd.f32 %v890_v50, %v1250_v1  ;;  %v575_v53 = vadd.f32 %v938_v51, %v1250_v1 }
  0xdf   :  { %v409_v54 = vpop.f32.mrf.mxu0  ;;  %v569_v55 = vpop.f32.mrf.mxu1 }
  0xe0   :  { %682 = vst.msk [vmem:[%s1575_s3 + $0x68] sm:$0xff] %vm668_vm2, %v415_v52  ;;  %714 = vst.msk [vmem:[%s1575_s3 + $0x168] sm:$0xff] %vm668_vm2, %v575_v53  ;;  %v410_v56 = vadd.f32 %v1250_v1, %v409_v54  ;;  %v570_v57 = vadd.f32 %v1250_v1, %v569_v55 }
  0xe1   :  { %v893_v58 = vpop.f32.mrf.mxu0  ;;  %v941_v59 = vpop.f32.mrf.mxu1 }
  0xe2   :  { %681 = vst.msk [vmem:[%s1575_s3 + $0x60] sm:$0xff] %vm668_vm2, %v410_v56  ;;  %713 = vst.msk [vmem:[%s1575_s3 + $0x160] sm:$0xff] %vm668_vm2, %v570_v57  ;;  %v425_v60 = vadd.f32 %v893_v58, %v1250_v1  ;;  %v585_v61 = vadd.f32 %v941_v59, %v1250_v1 }
  0xe3   :  { %v419_v62 = vpop.f32.mrf.mxu0  ;;  %v579_v63 = vpop.f32.mrf.mxu1 }
  0xe4   :  { %684 = vst.msk [vmem:[%s1575_s3 + $0x78] sm:$0xff] %vm668_vm2, %v425_v60  ;;  %716 = vst.msk [vmem:[%s1575_s3 + $0x178] sm:$0xff] %vm668_vm2, %v585_v61  ;;  %v420_v0 = vadd.f32 %v1250_v1, %v419_v62  ;;  %v580_v2 = vadd.f32 %v1250_v1, %v579_v63 }
  0xe5   :  { %v896_v3 = vpop.f32.mrf.mxu0  ;;  %v944_v4 = vpop.f32.mrf.mxu1 }
  0xe6   :  { %683 = vst.msk [vmem:[%s1575_s3 + $0x70] sm:$0xff] %vm668_vm2, %v420_v0  ;;  %715 = vst.msk [vmem:[%s1575_s3 + $0x170] sm:$0xff] %vm668_vm2, %v580_v2  ;;  %v435_v5 = vadd.f32 %v896_v3, %v1250_v1  ;;  %v595_v6 = vadd.f32 %v944_v4, %v1250_v1 }
  0xe7   :  { %v429_v7 = vpop.f32.mrf.mxu0  ;;  %v589_v8 = vpop.f32.mrf.mxu1 }
  0xe8   :  { %686 = vst.msk [vmem:[%s1575_s3 + $0x88] sm:$0xff] %vm668_vm2, %v435_v5  ;;  %718 = vst.msk [vmem:[%s1575_s3 + $0x188] sm:$0xff] %vm668_vm2, %v595_v6  ;;  %v430_v9 = vadd.f32 %v1250_v1, %v429_v7  ;;  %v590_v10 = vadd.f32 %v1250_v1, %v589_v8 }
  0xe9   :  { %v899_v11 = vpop.f32.mrf.mxu0  ;;  %v947_v12 = vpop.f32.mrf.mxu1 }
  0xea   :  { %685 = vst.msk [vmem:[%s1575_s3 + $0x80] sm:$0xff] %vm668_vm2, %v430_v9  ;;  %717 = vst.msk [vmem:[%s1575_s3 + $0x180] sm:$0xff] %vm668_vm2, %v590_v10  ;;  %v445_v13 = vadd.f32 %v899_v11, %v1250_v1  ;;  %v605_v14 = vadd.f32 %v947_v12, %v1250_v1 }
  0xeb   :  { %v439_v15 = vpop.f32.mrf.mxu0  ;;  %v599_v16 = vpop.f32.mrf.mxu1 }
  0xec   :  { %688 = vst.msk [vmem:[%s1575_s3 + $0x98] sm:$0xff] %vm668_vm2, %v445_v13  ;;  %720 = vst.msk [vmem:[%s1575_s3 + $0x198] sm:$0xff] %vm668_vm2, %v605_v14  ;;  %v440_v17 = vadd.f32 %v1250_v1, %v439_v15  ;;  %v600_v18 = vadd.f32 %v1250_v1, %v599_v16 }
  0xed   :  { %v902_v19 = vpop.f32.mrf.mxu0  ;;  %v950_v20 = vpop.f32.mrf.mxu1 }
  0xee   :  { %687 = vst.msk [vmem:[%s1575_s3 + $0x90] sm:$0xff] %vm668_vm2, %v440_v17  ;;  %719 = vst.msk [vmem:[%s1575_s3 + $0x190] sm:$0xff] %vm668_vm2, %v600_v18  ;;  %v455_v21 = vadd.f32 %v902_v19, %v1250_v1  ;;  %v615_v22 = vadd.f32 %v950_v20, %v1250_v1 }
  0xef   :  { %v449_v23 = vpop.f32.mrf.mxu0  ;;  %v609_v24 = vpop.f32.mrf.mxu1 }
  0xf0   :  { %690 = vst.msk [vmem:[%s1575_s3 + $0xa8] sm:$0xff] %vm668_vm2, %v455_v21  ;;  %722 = vst.msk [vmem:[%s1575_s3 + $0x1a8] sm:$0xff] %vm668_vm2, %v615_v22  ;;  %v450_v25 = vadd.f32 %v1250_v1, %v449_v23  ;;  %v610_v26 = vadd.f32 %v1250_v1, %v609_v24 }
  0xf1   :  { %v905_v27 = vpop.f32.mrf.mxu0  ;;  %v953_v28 = vpop.f32.mrf.mxu1 }
  0xf2   :  { %689 = vst.msk [vmem:[%s1575_s3 + $0xa0] sm:$0xff] %vm668_vm2, %v450_v25  ;;  %721 = vst.msk [vmem:[%s1575_s3 + $0x1a0] sm:$0xff] %vm668_vm2, %v610_v26  ;;  %v465_v29 = vadd.f32 %v905_v27, %v1250_v1  ;;  %v625_v30 = vadd.f32 %v953_v28, %v1250_v1 }
  0xf3   :  { %v459_v31 = vpop.f32.mrf.mxu0  ;;  %v619_v32 = vpop.f32.mrf.mxu1 }
  0xf4   :  { %692 = vst.msk [vmem:[%s1575_s3 + $0xb8] sm:$0xff] %vm668_vm2, %v465_v29  ;;  %724 = vst.msk [vmem:[%s1575_s3 + $0x1b8] sm:$0xff] %vm668_vm2, %v625_v30  ;;  %v460_v33 = vadd.f32 %v1250_v1, %v459_v31  ;;  %v620_v34 = vadd.f32 %v1250_v1, %v619_v32 }
  0xf5   :  { %v908_v35 = vpop.f32.mrf.mxu0  ;;  %v956_v36 = vpop.f32.mrf.mxu1 }
  0xf6   :  { %691 = vst.msk [vmem:[%s1575_s3 + $0xb0] sm:$0xff] %vm668_vm2, %v460_v33  ;;  %723 = vst.msk [vmem:[%s1575_s3 + $0x1b0] sm:$0xff] %vm668_vm2, %v620_v34  ;;  %v475_v37 = vadd.f32 %v908_v35, %v1250_v1  ;;  %v635_v38 = vadd.f32 %v956_v36, %v1250_v1 }
  0xf7   :  { %v469_v39 = vpop.f32.mrf.mxu0  ;;  %v629_v40 = vpop.f32.mrf.mxu1 }
  0xf8   :  { %694 = vst.msk [vmem:[%s1575_s3 + $0xc8] sm:$0xff] %vm668_vm2, %v475_v37  ;;  %726 = vst.msk [vmem:[%s1575_s3 + $0x1c8] sm:$0xff] %vm668_vm2, %v635_v38  ;;  %v470_v41 = vadd.f32 %v1250_v1, %v469_v39  ;;  %v630_v42 = vadd.f32 %v1250_v1, %v629_v40 }
  0xf9   :  { %v911_v43 = vpop.f32.mrf.mxu0  ;;  %v959_v44 = vpop.f32.mrf.mxu1 }
  0xfa   :  { %693 = vst.msk [vmem:[%s1575_s3 + $0xc0] sm:$0xff] %vm668_vm2, %v470_v41  ;;  %725 = vst.msk [vmem:[%s1575_s3 + $0x1c0] sm:$0xff] %vm668_vm2, %v630_v42  ;;  %v485_v45 = vadd.f32 %v911_v43, %v1250_v1  ;;  %v645_v46 = vadd.f32 %v959_v44, %v1250_v1 }
  0xfb   :  { %v479_v47 = vpop.f32.mrf.mxu0  ;;  %v639_v48 = vpop.f32.mrf.mxu1 }
  0xfc   :  { %696 = vst.msk [vmem:[%s1575_s3 + $0xd8] sm:$0xff] %vm668_vm2, %v485_v45  ;;  %728 = vst.msk [vmem:[%s1575_s3 + $0x1d8] sm:$0xff] %vm668_vm2, %v645_v46  ;;  %v480_v49 = vadd.f32 %v1250_v1, %v479_v47  ;;  %v640_v50 = vadd.f32 %v1250_v1, %v639_v48 }
  0xfd   :  { %v914_v51 = vpop.f32.mrf.mxu0  ;;  %v962_v52 = vpop.f32.mrf.mxu1 }
  0xfe   :  { %695 = vst.msk [vmem:[%s1575_s3 + $0xd0] sm:$0xff] %vm668_vm2, %v480_v49  ;;  %727 = vst.msk [vmem:[%s1575_s3 + $0x1d0] sm:$0xff] %vm668_vm2, %v640_v50  ;;  %v495_v53 = vadd.f32 %v914_v51, %v1250_v1  ;;  %v655_v54 = vadd.f32 %v962_v52, %v1250_v1 }
  0xff   :  { %v489_v55 = vpop.f32.mrf.mxu0  ;;  %v649_v56 = vpop.f32.mrf.mxu1 }
 0x100   :  { %698 = vst.msk [vmem:[%s1575_s3 + $0xe8] sm:$0xff] %vm668_vm2, %v495_v53  ;;  %730 = vst.msk [vmem:[%s1575_s3 + $0x1e8] sm:$0xff] %vm668_vm2, %v655_v54  ;;  %v490_v57 = vadd.f32 %v1250_v1, %v489_v55  ;;  %v650_v58 = vadd.f32 %v1250_v1, %v649_v56 }
 0x101   :  { %v917_v59 = vpop.f32.mrf.mxu0  ;;  %v965_v60 = vpop.f32.mrf.mxu1 }
 0x102   :  { %697 = vst.msk [vmem:[%s1575_s3 + $0xe0] sm:$0xff] %vm668_vm2, %v490_v57  ;;  %729 = vst.msk [vmem:[%s1575_s3 + $0x1e0] sm:$0xff] %vm668_vm2, %v650_v58  ;;  %v505_v61 = vadd.f32 %v917_v59, %v1250_v1  ;;  %v665_v62 = vadd.f32 %v965_v60, %v1250_v1 }
 0x103   :  { %v499_v63 = vpop.f32.mrf.mxu0  ;;  %v659_v0 = vpop.f32.mrf.mxu1 }
 0x104   :  { %700 = vst.msk [vmem:[%s1575_s3 + $0xf8] sm:$0xff] %vm668_vm2, %v505_v61  ;;  %732 = vst.msk [vmem:[%s1575_s3 + $0x1f8] sm:$0xff] %vm668_vm2, %v665_v62  ;;  %v500_v2 = vadd.f32 %v1250_v1, %v499_v63  ;;  %v660_v3 = vadd.f32 %v1250_v1, %v659_v0 }
 0x106   :  { %699 = vst.msk [vmem:[%s1575_s3 + $0xf0] sm:$0xff] %vm668_vm2, %v500_v2  ;;  %731 = vst.msk [vmem:[%s1575_s3 + $0x1f0] sm:$0xff] %vm668_vm2, %v660_v3 }

</bundles_post_ra>
